<compile_context>
chip_gen: v5e
topology: v5e:2x2
jax: 0.10.0
libtpu: 0.0.40
codegen_flags: <defaults>
</compile_context>

<pallas_src>
import jax
import jax.numpy as jnp
from jax.experimental import pallas as pl
from jax.experimental.pallas import tpu as pltpu


def resblock_kernel(x_ref, w1_ref, b1_ref, w2_ref, b2_ref, o_ref):
    x = x_ref[...]                                   # (TILE_B, Fp) f32 — kept for residual
    b1 = b1_ref[...]                                 # (1, Fp) f32, read once (broadcast in the add)
    b2 = b2_ref[...]                                 # (1, Fp) f32

    # fc1: bf16 operands on the MXU, f32 accumulation.
    h = jnp.dot(x.astype(jnp.bfloat16), w1_ref[...],
                preferred_element_type=jnp.float32) + b1
    h = jnp.maximum(h, 0.0)                          # ReLU

    # fc2
    y = jnp.dot(h.astype(jnp.bfloat16), w2_ref[...],
                preferred_element_type=jnp.float32) + b2

    # residual + final ReLU, single cast at the store.
    o_ref[...] = jnp.maximum(x + y, 0.0).astype(o_ref.dtype)


def resblock_forward(x, w1, b1, w2, b2, *, tile_b=8, lane=128):
    """x: [B, F] f32; w1/w2: [F, F] (PyTorch Linear layout, y = x @ W^T + b); b1/b2: [F]."""
    B, F = x.shape
    Fp = ((F + lane - 1) // lane) * lane             # lane-dense feature dim (>=128)
    Bp = ((B + tile_b - 1) // tile_b) * tile_b       # batch padded to the tile size

    # Zero-padding is exact: padded x columns are 0, padded weight rows/cols are 0,
    # padded bias entries are 0, so padded output columns stay 0 and are sliced off.
    x_p = jnp.zeros((Bp, Fp), x.dtype).at[:B, :F].set(x)
    w1_t = jnp.zeros((Fp, Fp), jnp.bfloat16).at[:F, :F].set(w1.T.astype(jnp.bfloat16))
    w2_t = jnp.zeros((Fp, Fp), jnp.bfloat16).at[:F, :F].set(w2.T.astype(jnp.bfloat16))
    b1_p = jnp.zeros((1, Fp), jnp.float32).at[0, :F].set(b1)
    b2_p = jnp.zeros((1, Fp), jnp.float32).at[0, :F].set(b2)

    grid = (Bp // tile_b,)
    out_p = pl.pallas_call(
        resblock_kernel,
        out_shape=jax.ShapeDtypeStruct((Bp, Fp), x.dtype),
        grid_spec=pl.GridSpec(
            grid=grid,
            in_specs=[
                pl.BlockSpec((tile_b, Fp), lambda i: (i, 0)),   # x tile, pipelined over batch
                pl.BlockSpec((Fp, Fp), lambda i: (0, 0)),       # W1^T, resident in VMEM
                pl.BlockSpec((1, Fp), lambda i: (0, 0)),        # b1, resident
                pl.BlockSpec((Fp, Fp), lambda i: (0, 0)),       # W2^T, resident
                pl.BlockSpec((1, Fp), lambda i: (0, 0)),        # b2, resident
            ],
            out_specs=pl.BlockSpec((tile_b, Fp), lambda i: (i, 0)),
        ),
        compiler_params=pltpu.CompilerParams(
            dimension_semantics=("parallel",),       # batch tiles are independent (2 TCs on v7x)
        ),
    )(x_p, w1_t, b1_p, w2_t, b2_p)

    return out_p[:B, :F]


def resblock_reference(x, w1, b1, w2, b2):
    h = jnp.maximum(x @ w1.T + b1, 0.0)
    y = x + (h @ w2.T + b2)
    return jnp.maximum(y, 0.0)


if __name__ == "__main__":
    key = jax.random.PRNGKey(0)
    B, FEAT = 16, 32

    k_x, k_w1, k_b1, k_w2, k_b2 = jax.random.split(key, 5)
    # Deterministic init mimicking nn.Linear default: U(-1/sqrt(F), 1/sqrt(F))
    bound = 1.0 / jnp.sqrt(jnp.float32(FEAT))
    x = jax.random.normal(k_x, (B, FEAT), dtype=jnp.float32)
    w1 = jax.random.uniform(k_w1, (FEAT, FEAT), minval=-bound, maxval=bound, dtype=jnp.float32)
    b1 = jax.random.uniform(k_b1, (FEAT,), minval=-bound, maxval=bound, dtype=jnp.float32)
    w2 = jax.random.uniform(k_w2, (FEAT, FEAT), minval=-bound, maxval=bound, dtype=jnp.float32)
    b2 = jax.random.uniform(k_b2, (FEAT,), minval=-bound, maxval=bound, dtype=jnp.float32)

    out = resblock_forward(x, w1, b1, w2, b2)
    jax.block_until_ready(out)

    ref = resblock_reference(x, w1, b1, w2, b2)
    # bf16 matmul operands (f32 accumulation) -> loosened tolerance vs. full-f32 reference.
    assert out.shape == ref.shape, "shape mismatch vs reference"
    assert jnp.allclose(out, ref, atol=3e-2, rtol=3e-2), "mismatch vs reference"

    print("KERNEL_OK")
</pallas_src>

<mosaic_0001>
module attributes {stable_mosaic.version = 11 : i64} {
  func.func @resblock_kernel(%arg0: i32, %arg1: memref<8x128xf32, #tpu.memory_space<vmem>>, %arg2: memref<128x128xbf16, #tpu.memory_space<vmem>>, %arg3: memref<1x128xf32, #tpu.memory_space<vmem>>, %arg4: memref<128x128xbf16, #tpu.memory_space<vmem>>, %arg5: memref<1x128xf32, #tpu.memory_space<vmem>>, %arg6: memref<8x128xf32, #tpu.memory_space<vmem>>) attributes {dimension_semantics = [#tpu.dimension_semantics<parallel>], iteration_bounds = array<i64: 2>, scalar_prefetch = 0 : i64, scratch_operands = 0 : i64, tpu.core_type = #tpu.core_type<tc>, window_params = [{transform_indices = @transform_0, window_bounds = array<i64: 8, 128>}, {pipeline_mode = #tpu.pipeline_mode<synchronous>, transform_indices = @transform_1, window_bounds = array<i64: 128, 128>}, {pipeline_mode = #tpu.pipeline_mode<synchronous>, transform_indices = @transform_2, window_bounds = array<i64: 1, 128>}, {pipeline_mode = #tpu.pipeline_mode<synchronous>, transform_indices = @transform_3, window_bounds = array<i64: 128, 128>}, {pipeline_mode = #tpu.pipeline_mode<synchronous>, transform_indices = @transform_4, window_bounds = array<i64: 1, 128>}, {transform_indices = @transform_5, window_bounds = array<i64: 8, 128>}]} {
    %c0 = arith.constant 0 : index
    %c0_0 = arith.constant 0 : index
    %0 = vector.load %arg1[%c0, %c0_0] : memref<8x128xf32, #tpu.memory_space<vmem>>, vector<8x128xf32>
    %c0_1 = arith.constant 0 : index
    %c0_2 = arith.constant 0 : index
    %1 = vector.load %arg3[%c0_1, %c0_2] : memref<1x128xf32, #tpu.memory_space<vmem>>, vector<1x128xf32>
    %c0_3 = arith.constant 0 : index
    %c0_4 = arith.constant 0 : index
    %2 = vector.load %arg5[%c0_3, %c0_4] : memref<1x128xf32, #tpu.memory_space<vmem>>, vector<1x128xf32>
    %3 = arith.truncf %0 : vector<8x128xf32> to vector<8x128xbf16>
    %c0_5 = arith.constant 0 : index
    %c0_6 = arith.constant 0 : index
    %4 = vector.load %arg2[%c0_5, %c0_6] : memref<128x128xbf16, #tpu.memory_space<vmem>>, vector<128x128xbf16>
    %cst = arith.constant dense<0.000000e+00> : vector<8x128xf32>
    %5 = tpu.matmul %3, %4, %cst {dimension_numbers = #tpu.dot_dimension_numbers<[1], [0], [0], [1], [0, 0, 1, 1], [], []>} : vector<8x128xbf16>, vector<128x128xbf16>, vector<8x128xf32> -> vector<8x128xf32>
    %6 = vector.broadcast %1 : vector<1x128xf32> to vector<8x128xf32>
    %7 = arith.addf %5, %6 : vector<8x128xf32>
    %cst_7 = arith.constant 0.000000e+00 : f32
    %8 = vector.broadcast %cst_7 : f32 to vector<8x128xf32>
    %9 = arith.maximumf %7, %8 : vector<8x128xf32>
    %10 = arith.truncf %9 : vector<8x128xf32> to vector<8x128xbf16>
    %c0_8 = arith.constant 0 : index
    %c0_9 = arith.constant 0 : index
    %11 = vector.load %arg4[%c0_8, %c0_9] : memref<128x128xbf16, #tpu.memory_space<vmem>>, vector<128x128xbf16>
    %cst_10 = arith.constant dense<0.000000e+00> : vector<8x128xf32>
    %12 = tpu.matmul %10, %11, %cst_10 {dimension_numbers = #tpu.dot_dimension_numbers<[1], [0], [0], [1], [0, 0, 1, 1], [], []>} : vector<8x128xbf16>, vector<128x128xbf16>, vector<8x128xf32> -> vector<8x128xf32>
    %13 = vector.broadcast %2 : vector<1x128xf32> to vector<8x128xf32>
    %14 = arith.addf %12, %13 : vector<8x128xf32>
    %15 = arith.addf %0, %14 : vector<8x128xf32>
    %cst_11 = arith.constant 0.000000e+00 : f32
    %16 = vector.broadcast %cst_11 : f32 to vector<8x128xf32>
    %17 = arith.maximumf %15, %16 : vector<8x128xf32>
    %c0_12 = arith.constant 0 : index
    %c0_13 = arith.constant 0 : index
    %18 = vector.load %arg6[%c0_12, %c0_13] : memref<8x128xf32, #tpu.memory_space<vmem>>, vector<8x128xf32>
    tpu.vector_store %arg6[%c0_12, %c0_13], %17 {strides = array<i32>} : memref<8x128xf32, #tpu.memory_space<vmem>>, vector<8x128xf32>,
    return
  }
  func.func @transform_0(%arg0: i32) -> (i32, i32) {
    %c0_i32 = arith.constant 0 : i32
    %c0_i32_0 = arith.constant 0 : i32
    return %arg0, %c0_i32 : i32, i32
  }
  func.func @transform_1(%arg0: i32) -> (i32, i32) {
    %c0_i32 = arith.constant 0 : i32
    %c0_i32_0 = arith.constant 0 : i32
    %c0_i32_1 = arith.constant 0 : i32
    return %c0_i32, %c0_i32_0 : i32, i32
  }
  func.func @transform_2(%arg0: i32) -> (i32, i32) {
    %c0_i32 = arith.constant 0 : i32
    %c0_i32_0 = arith.constant 0 : i32
    %c0_i32_1 = arith.constant 0 : i32
    return %c0_i32, %c0_i32_0 : i32, i32
  }
  func.func @transform_3(%arg0: i32) -> (i32, i32) {
    %c0_i32 = arith.constant 0 : i32
    %c0_i32_0 = arith.constant 0 : i32
    %c0_i32_1 = arith.constant 0 : i32
    return %c0_i32, %c0_i32_0 : i32, i32
  }
  func.func @transform_4(%arg0: i32) -> (i32, i32) {
    %c0_i32 = arith.constant 0 : i32
    %c0_i32_0 = arith.constant 0 : i32
    %c0_i32_1 = arith.constant 0 : i32
    return %c0_i32, %c0_i32_0 : i32, i32
  }
  func.func @transform_5(%arg0: i32) -> (i32, i32) {
    %c0_i32 = arith.constant 0 : i32
    %c0_i32_0 = arith.constant 0 : i32
    return %arg0, %c0_i32 : i32, i32
  }
}

</mosaic_0001>

<bundles_post_ra>
// kernel: tpu_custom_call.1
= control target key start
LH: loop header
LB: loop body
LE: loop exit
PB: predicated region body
PF: predicated region fallthrough
CT: control target
= control target key end

     0   :  { %10 = vsyncpa [#allocation3], 0  ;;  %s1070_s0 = inlined_call_operand.hbm [shape: f32[16,128], index: 0, kind: input, shape index: {}]   ;;  %s1071_s1 = inlined_call_operand.hbm [shape: bf16[128,128], index: 1, kind: input, shape index: {}]   ;;  %s1072_s2 = inlined_call_operand.vmem [shape: f32[1,128], index: 2, kind: input, shape index: {}]   ;;  %s1073_s3 = inlined_call_operand.hbm [shape: bf16[128,128], index: 3, kind: input, shape index: {}]   ;;  %s1074_s4 = inlined_call_operand.vmem [shape: f32[1,128], index: 4, kind: input, shape index: {}]   ;;  %s1075_s5 = inlined_call_operand.hbm [shape: f32[16,128], index: 5, kind: output, shape index: {}]  }
   0x1   :  { %12 = vsyncpa [#allocation3 + $0x1], 0 }
   0x2   :  { %13 = vsyncpa [#allocation6], 0 }
   0x3   :  { %14 = vsyncpa [#allocation4], 0 }
   0x4   :  { %16 = vsyncpa [#allocation4 + $0x1], 0  ;;  %s912_s18 = smov 0   ;;  %s914_s19 = smov 0  }
   0x5   :  { %s916_s20 = smov 0   ;;  %s918_s21 = smov 0  }
   0x6 LB: > { %s174_s24 = sshll.u32 %s1071_s1, 4  ;;  %s936_s25 = sadd.s32 4294967295, %s876_s21   ;;  %s876_s21 = sphi %s918_s21, %s1086_s21   ;;  %s872_s20 = sphi %s916_s20, %s1085_s20   ;;  %s868_s19 = sphi %s914_s19, %s1084_s19   ;;  %s864_s18 = sphi %s912_s18, %s1083_s18   ;;  %s175_s24 = int_to_ptr.hbm [resolvable:$true] %s174_s24 }
   0x7   : > { %p550_p0 = scmp.ge.s32.totalorder %s876_s21, 1  ;;  %p43_p1 = scmp.eq.s32.totalorder %s936_s25, 0 }
   0x8   : > { %p163_p2 = scmp.lt.s32.totalorder %s876_s21, 3  ;;  %s878_s27 = smov [#allocation5]  }
   0x9   : > { %s176_s28 = sshll.u32 %s878_s27, 4  ;;  %s191_s6 = sshll.u32 %s1073_s3, 4  ;;  %s177_s28 = int_to_ptr.vmem [resolvable:$true] %s176_s28  ;;  %s192_s6 = int_to_ptr.hbm [resolvable:$true] %s191_s6 }
   0xa   : > { %p941_p3 = pnand %p550_p0, %p163_p2  ;;  %s879_s7 = smov [#allocation7]  }
   0xb   : > { %s193_s8 = sshll.u32 %s879_s7, 4  ;;  %s880_s9 = smov 64   ;;  %s194_s8 = int_to_ptr.vmem [resolvable:$true] %s193_s8 }
   0xc   : > { %p657_p4 = pneg %p941_p3  ;;  %s881_s10 = smov 4  }
   0xd   : > { %s549_s11 = sadd.s32 4294967294, %s876_s21   ;;  %s955_s12 = sadd.s32 1, %s876_s21  }
   0xe   : > { %p658_p6 = pnand %p657_p4, %p43_p1  ;;  %s26_s13 = ssub.s32 %s876_s21, %s955_s12 }
   0xf   : > { %s29_s14 = sadd.s32 1, %s872_s20  ;;  %p27_p7 = scmp.eq.s32.totalorder %s26_s13, 0 }
  0x10   : > { %660 = dma.hbm_to_vmem [thread:$0]  (!%p658_p6), %s175_s24, 1024, %s177_s28, [#allocation6], %s880_s9, %s880_s9, %s881_s10  }
  0x11   : > { %663 = dma.hbm_to_vmem [thread:$0]  (!%p658_p6), %s192_s6, 1024, %s194_s8, [#allocation6], %s880_s9, %s880_s9, %s881_s10  }
  0x12   : > { %p36_p8 = scmp.ne.s32.totalorder %s872_s20, %s868_s19  ;;  %p37_p9 = scmp.eq.s32.totalorder %s876_s21, 0 }
  0x13   : > { %p42_p10 = scmp.ne.s32.totalorder %s868_s19, %s864_s18  ;;  %p150_p13 = scmp.eq.s32.totalorder %s936_s25, 1 }
  0x14   : > { %s966_s15 = scalar_select %p27_p7, %s872_s20, %s29_s14  }
  0x15   : > { %p968_p11 = por %p37_p9, %p36_p8  ;;  %p974_p12 = por %p43_p1, %p42_p10 }
  0x16   : > { %p156_p0 = scmp.eq.s32.totalorder %s549_s11, 1  ;;  %p674_p2 = scmp.lt.s32.totalorder %s876_s21, 2 }
  0x17   : > { %s210_s22 = sand.u32 1, %s872_s20   ;;  %p981_p4 = por %p150_p13, %p36_p8 }
  0x18   : > { %p985_p6 = por %p156_p0, %p42_p10  ;;  %s554_s27 = sshll.u32 %s210_s22, 3 }
  0x19   : > { %s555_s28 = sshll.u32 %s876_s21, 3  ;;  %s214_s7 = scalar_lea.vmem [#allocation2], %s554_s27 }
  0x1a   : > { %s218_s6 = scalar_lea.hbm %s1070_s0, %s555_s28  ;;  %s222_s8 = sshll.u32 %s214_s7, 4  ;;  %s223_s8 = int_to_ptr.vmem [resolvable:$true] %s222_s8 }
  0x1b   : > { %s220_s9 = sshll.u32 %s218_s6, 4  ;;  %p995_p7 = pnand %p674_p2, %p968_p11  ;;  %s221_s9 = int_to_ptr.hbm [resolvable:$true] %s220_s9 }
  0x1c   : > { %s211_s11 = scalar_lea.sflag [#allocation3], %s210_s22  ;;  %s776_s13 = sshra.s32 %s221_s9, 4  ;;  %s777_s13 = int_to_ptr.hbm [resolvable:$true] %s776_s13 }
  0x1d   : > { %s778_s14 = scalar_lea.hbm %s777_s13, 8  ;;  %p780_p9 = pneg %p995_p7 }
  0x1e   : > { %p779_p8 = scmp.ne.s32.totalorder %s777_s13, %s778_s14  ;;  %s783_s29 = scalar_lea.hbm %s1070_s0, 16 }
  0x1f   : > { %p784_p11 = scmp.lt.s32.totalorder %s777_s13, %s1070_s0  ;;  %p785_p0 = scmp.lt.s32.totalorder %s783_s29, %s778_s14 }
  0x20   : > { %p781_p10 = pnand %p780_p9, %p779_p8 }
  0x21   : > { %p786_p2 = por %p785_p0, %p784_p11 }
  0x22   : > { %p782_p13 = pneg %p781_p10 }
  0x24   : > { %p787_p5 = pnand %p786_p2, %p782_p13 }
  0x26   : > { %790 = shalt.err (!%p787_p5)
}
  0x27   : > { %667 = dma.hbm_to_vmem [thread:$0]  (!%p995_p7), %s221_s9, 128, %s223_s8, %s211_s11  }
  0x28   : > { %231 = sbr.rel (%p941_p3) target bundleno = 348 (0x15c), region = 40  ;;  %s1012_s22 = sand.u32 (!%p941_p3), 1, %s868_s19  }
  0x29   : > { %s557_s6 = sshll.u32 (!%p941_p3), %s1012_s22, 3  ;;  %s234_s7 = scalar_lea.sflag (!%p941_p3), [#allocation3], %s1012_s22 }
  0x2a   : > { %s1018_s13 = scalar_lea.vmem (!%p941_p3), [#allocation2], %s557_s6 }
  0x2d   : > { %851 = dma.done.wait (%p974_p12), %s234_s7, 128  }
  0x2e   : > { %853 = vsyncadd (%p974_p12), %s234_s7, 4294967168 }
  0x2f   : > { %855 = dma.done.wait (%p43_p1), [#allocation6], 2048  }
  0x30   : > { %857 = vsyncadd (%p43_p1), [#allocation6], 4294965248  ;;  %v636_v0 = vld [vmem:[#allocation5 + $0x38] sm:$0xff]  ;;  %v635_v1 = vld [vmem:[#allocation5 + $0x30] sm:$0xff]  ;;  %s626_s8 = sshll.u32 %s936_s25, 3  ;;  %s274_s28 = scalar_lea.vmem [#allocation8], %s557_s6 }
  0x31   : > { %346 = vmatpush.bf16.msra.mxu0 %v636_v0  ;;  %v644_v2 = vld [vmem:[#allocation7 + $0x38] sm:$0xff]  ;;  %v643_v3 = vld [vmem:[#allocation7 + $0x30] sm:$0xff]  ;;  %v634_v4 = vld [vmem:[#allocation5 + $0x28] sm:$0xff]  ;;  %s455_s27 = scalar_lea.hbm %s1075_s5, %s626_s8  ;;  %s457_s29 = sshll.u32 %s274_s28, 4  ;;  %s458_s29 = int_to_ptr.vmem [resolvable:$true] %s457_s29 }
  0x32   : > { %428 = vmatpush.bf16.msra.mxu1 %v644_v2  ;;  %v642_v5 = vld [vmem:[#allocation7 + $0x28] sm:$0xff]  ;;  %v633_v6 = vld [vmem:[#allocation5 + $0x20] sm:$0xff]  ;;  %v632_v8 = vld [vmem:[#allocation5 + $0x18] sm:$0xff]  ;;  %s459_s30 = sshll.u32 %s455_s27, 4  ;;  %s445_s25 = scalar_lea.sflag [#allocation4], %s1012_s22  ;;  %s460_s30 = int_to_ptr.hbm [resolvable:$true] %s459_s30 }
  0x33   : > { %v641_v7 = vld [vmem:[#allocation7 + $0x20] sm:$0xff]  ;;  %v640_v9 = vld [vmem:[#allocation7 + $0x18] sm:$0xff]  ;;  %v631_v10 = vld [vmem:[#allocation5 + $0x10] sm:$0xff]  ;;  %s820_s16 = sshra.s32 %s460_s30, 4  ;;  %s826_s6 = scalar_lea.hbm %s1075_s5, 16  ;;  %s821_s16 = int_to_ptr.hbm [resolvable:$true] %s820_s16 }
  0x34   : > { %v639_v11 = vld [vmem:[#allocation7 + $0x10] sm:$0xff]  ;;  %v630_v12 = vld [vmem:[#allocation5 + $0x8] sm:$0xff]  ;;  %v629_v13 = vld [vmem:[#allocation5] sm:$0xff]  ;;  %s822_s7 = scalar_lea.hbm %s821_s16, 8  ;;  %p827_p12 = scmp.lt.s32.totalorder %s821_s16, %s1075_s5 }
  0x35   : > { %347 = vmatpush.bf16.msra.mxu0 %v635_v1  ;;  %v275_v14 = vld [vmem:[%s1018_s13] sm:$0xff]  ;;  %v638_v16 = vld [vmem:[#allocation7 + $0x8] sm:$0xff]  ;;  %v637_v17 = vld [vmem:[#allocation7] sm:$0xff]  ;;  %p823_p1 = scmp.ne.s32.totalorder %s821_s16, %s822_s7  ;;  %p828_p7 = scmp.lt.s32.totalorder %s826_s6, %s822_s7 }
  0x36   : > { %429 = vmatpush.bf16.msra.mxu1 %v643_v3  ;;  %v278_v15 = vpack.c.bf16 %v275_v14, %v275_v14  ;;  %v714_v18 = vld [vmem:[%s1072_s2] ss:$0 sm:$0xff] }
  0x37   : > { %v715_v24 = vld [vmem:[%s1074_s4] ss:$0 sm:$0xff]  ;;  %p824_p3 = pnand %p823_p1, %p981_p4  ;;  %p829_p8 = por %p828_p7, %p827_p12 }
  0x39   : > { %348 = vmatpush.bf16.msra.mxu0 %v634_v4  ;;  %p825_p5 = pneg %p824_p3 }
  0x3a   : > { %430 = vmatpush.bf16.msra.mxu1 %v642_v5 }
  0x3b   : > { %p830_p9 = pnand %p829_p8, %p825_p5 }
  0x3d   : > { %349 = vmatpush.bf16.msra.mxu0 %v633_v6 }
  0x3e   : > { %431 = vmatpush.bf16.msra.mxu1 %v641_v7 }
  0x41   : > { %350 = vmatpush.bf16.msra.mxu0 %v632_v8 }
  0x42   : > { %432 = vmatpush.bf16.msra.mxu1 %v640_v9 }
  0x45   : > { %351 = vmatpush.bf16.msra.mxu0 %v631_v10 }
  0x46   : > { %433 = vmatpush.bf16.msra.mxu1 %v639_v11 }
  0x49   : > { %352 = vmatpush.bf16.msra.mxu0 %v630_v12 }
  0x4a   : > { %434 = vmatpush.bf16.msra.mxu1 %v638_v16 }
  0x4d   : > { %353 = vmatpush.bf16.msra.mxu0 %v629_v13 }
  0x4e   : > { %435 = vmatpush.bf16.msra.mxu1 %v637_v17 }
  0x50   : > { %354 = vmatmul.bf16.vlgmr.msra.gmra.mxu0 %v278_v15 }
  0xcd   : > { %v355_v19 = vpop.f32.mrf.mxu0 }
  0xce   : > { %v356_v20 = vadd.f32 %v714_v18, %v355_v19 }
  0xd0   : > { %v359_v21 = vmax.f32 %v356_v20, 0.0 }
  0xd2   : > { %v360_v22 = vpack.c.bf16 %v359_v21, %v359_v21 }
  0xd4   : > { %436 = vmatmul.bf16.vlgmr.msra.gmra.mxu1 %v360_v22 }
  0xd5   : > { %v357_v23 = vpop.f32.mrf.mxu0 }
 0x151   : > { %v437_v25 = vpop.f32.mrf.mxu1 }
 0x152   : > { %v438_v26 = vadd.f32 %v715_v24, %v437_v25 }
 0x154   : > { %v441_v27 = vadd.f32 %v438_v26, %v275_v14 }
 0x156   : > { %v442_v28 = vmax.f32 %v441_v27, 0.0 }
 0x158   : > { %443 = vst [vmem:[%s274_s28] sm:$0xff] %v442_v28 }
 0x159   : > { %v439_v29 = vpop.f32.mrf.mxu1 }
 0x15a   : > { %833 = shalt.err (!%p830_p9)
}
 0x15b   : > { %655 = dma.vmem_to_hbm [thread:$0]  (%p981_p4), %s458_s29, 128, %s460_s30, %s445_s25  }
 0x15c PF: > { %s471_s22 = sand.u32 1, %s864_s18   ;;  %p1082_p10 = scmp.ge.s32.totalorder %s876_s21, 2 }
 0x15d   : > { %s472_s9 = scalar_lea.sflag [#allocation4], %s471_s22 }
 0x15e   : > { %p669_p13 = pnand %p1082_p10, %p985_p6 }
 0x160   : > { %p670_p11 = pneg %p669_p13 }
 0x162   : > { %859 = dma.done.wait (%p670_p11), %s472_s9, 128  }
 0x163   : > { %861 = vsyncadd (%p670_p11), %s472_s9, 4294967168  ;;  %p19_p0 = scmp.ge.s32.totalorder %s955_s12, 4   ;;  %s1083_s18 = smov %s868_s19 }
 0x164   : > { %s1084_s19 = smov %s872_s20  ;;  %s1085_s20 = smov %s966_s15 }
 0x165   : > { %s1086_s21 = smov %s955_s12  ;;  %21 = sbr.rel (!%p19_p0) target bundleno = 6 (0x6), region = 93 }
 0x16a   :  { %478 = vsyncpa [#allocation3], 1 }
 0x16b   :  { %480 = vsyncpa [#allocation3 + $0x1], 1 }
 0x16c   :  { %481 = vsyncpa [#allocation6], 1 }
 0x16d   :  { %482 = vsyncpa [#allocation4], 1 }
 0x16e   :  { %484 = vsyncpa [#allocation4 + $0x1], 1 }

</bundles_post_ra>
